<compile_context>
chip_gen: v5e
topology: v5e:2x2
jax: 0.10.0
libtpu: 0.0.40
codegen_flags: <defaults>
</compile_context>

<pallas_src>
import jax
import jax.numpy as jnp
from jax.experimental import pallas as pl
from jax.experimental.pallas import tpu as pltpu


def skipgram_gather_kernel(idx_ref, table_ref, out_ref):
    """Batched row gather: out[r, :] = fused_table[ids[base + r], :].

    idx_ref:   (B,)    int32 token ids, scalar-prefetched into SMEM.
    table_ref: (V, O)  fused lookup table, VMEM-resident (constant index_map).
    out_ref:   (TB, O) output tile for this grid step.
    """
    tb = out_ref.shape[0]
    v = table_ref.shape[0]
    base = pl.program_id(0) * tb

    def copy_row(r, carry):
        # SMEM scalar read -> clamp (jnp.take semantics for OOB ids) ->
        # one dynamic-row VMEM load + one dynamic-row VMEM store (sublane axis).
        tok = jnp.clip(idx_ref[base + r], 0, v - 1)
        out_ref[pl.ds(r, 1), :] = table_ref[pl.ds(tok, 1), :]
        return carry

    # Unroll short tiles (LLO scheduling visibility); loop long ones.
    jax.lax.fori_loop(0, tb, copy_row, None, unroll=(tb <= 32))


def fold_skipgram_params(emb_table, w1_t, b1, w2_t, b2):
    """Fold Embedding -> Linear -> Linear into one (V, O) lookup table.

    Exact in real arithmetic (the forward has no nonlinearity):
      onehot(x) @ T @ W1 @ W2 + b1 @ W2 + b2
        == onehot(x) @ (T @ W1 @ W2 + b1 @ W2 + b2)
    Do this once at parameter-load time for static weights.
    """
    hi = jax.lax.Precision.HIGHEST
    w_fold = jnp.dot(w1_t, w2_t, precision=hi)                        # (E, O)
    b_fold = jnp.dot(b1, w2_t, precision=hi) + b2                     # (O,)
    fused_table = jnp.dot(emb_table, w_fold, precision=hi) + b_fold   # (V, O)
    return fused_table


def _pick_batch_tile(batch):
    """Largest aligned tile that still gives >=2 grid steps at large batch."""
    if batch <= 128:
        return batch                      # single grid step; tiny kernel
    for tile in (1024, 512, 256, 128):    # multiples of the 8-sublane tile
        if batch % tile == 0 and batch // tile >= 2:
            return tile                   # >=2 steps -> both v7x TensorCores
    return batch


def skip_gram_forward(input_word, fused_table, *, batch_tile=None):
    """input_word: (B,) int token ids -> (B, O) activations, O = C * E."""
    batch = input_word.shape[0]
    v, o = fused_table.shape

    if batch_tile is None:
        batch_tile = _pick_batch_tile(batch)
    assert batch % batch_tile == 0, "batch must be divisible by batch_tile"
    grid = (batch // batch_tile,)

    ids = input_word.astype(jnp.int32)

    # NOTE: for a large vocab, swap the VMEM-resident table for a
    # scalar-prefetched per-row gather (pl.Element(1) index_map on the (V, O)
    # table) or a manual double-buffered DMA gather; VMEM then stays O(TB*O).
    return pl.pallas_call(
        skipgram_gather_kernel,
        out_shape=jax.ShapeDtypeStruct((batch, o), fused_table.dtype),
        grid_spec=pltpu.PrefetchScalarGridSpec(
            num_scalar_prefetch=1,                 # ids -> SMEM
            grid=grid,
            in_specs=[
                pl.BlockSpec((v, o), lambda i, ids_ref: (0, 0)),  # fused table
            ],
            out_specs=pl.BlockSpec((batch_tile, o), lambda i, ids_ref: (i, 0)),
        ),
        compiler_params=pltpu.CompilerParams(
            dimension_semantics=("parallel",)),
    )(ids, fused_table)


if __name__ == "__main__":
    # Small, module-consistent shapes.
    vocab_size = 64
    embedding_dim = 32
    projection_dim = 32
    training_context_size = 4
    out_dim = training_context_size * embedding_dim   # 128
    batch = 8

    key = jax.random.PRNGKey(0)
    k_emb, k_w1, k_b1, k_w2, k_b2, k_idx = jax.random.split(key, 6)

    # Deterministic synthetic parameters (shapes follow the PyTorch __init__).
    emb_table = jax.random.normal(k_emb, (vocab_size, embedding_dim), jnp.float32)
    # PyTorch Linear stores (out, in); we keep the transposed (in, out) layout.
    w1_t = jax.random.normal(k_w1, (embedding_dim, projection_dim), jnp.float32) * 0.1
    b1 = jax.random.normal(k_b1, (projection_dim,), jnp.float32) * 0.1
    w2_t = jax.random.normal(k_w2, (projection_dim, out_dim), jnp.float32) * 0.1
    b2 = jax.random.normal(k_b2, (out_dim,), jnp.float32) * 0.1

    input_word = jax.random.randint(k_idx, (batch,), 0, vocab_size, jnp.int32)

    # Fold the whole model into one lookup table (once, at load time).
    fused_table = fold_skipgram_params(emb_table, w1_t, b1, w2_t, b2)

    out = skip_gram_forward(input_word, fused_table)
    out = jax.block_until_ready(out)

    # Reference: the unfused two-layer forward (same math as the PyTorch module).
    hi = jax.lax.Precision.HIGHEST
    emb = jnp.take(emb_table, input_word, axis=0)
    ref = jnp.dot(emb, w1_t, precision=hi) + b1
    ref = jnp.dot(ref, w2_t, precision=hi) + b2

    assert out.shape == (batch, out_dim)
    assert jnp.allclose(out, ref, atol=1e-4, rtol=1e-4), \
        float(jnp.max(jnp.abs(out - ref)))

    print("KERNEL_OK")
</pallas_src>

<mosaic_0001>
module attributes {stable_mosaic.version = 11 : i64} {
  func.func @skipgram_gather_kernel(%arg0: i32, %arg1: memref<8xi32, #tpu.memory_space<smem>>, %arg2: memref<64x128xf32, #tpu.memory_space<vmem>>, %arg3: memref<8x128xf32, #tpu.memory_space<vmem>>) attributes {dimension_semantics = [#tpu.dimension_semantics<parallel>], iteration_bounds = array<i64: 1>, scalar_prefetch = 1 : i64, scratch_operands = 0 : i64, tpu.core_type = #tpu.core_type<tc>, window_params = [{pipeline_mode = #tpu.pipeline_mode<synchronous>, transform_indices = @transform_0, window_bounds = array<i64: 64, 128>}, {transform_indices = @transform_1, window_bounds = array<i64: 8, 128>}]} {
    %c8_i32 = arith.constant 8 : i32
    %0 = arith.muli %arg0, %c8_i32 : i32
    %c0_i32 = arith.constant 0 : i32
    %1 = arith.addi %0, %c0_i32 : i32
    %2 = arith.index_cast %1 : i32 to index
    %3 = memref.load %arg1[%2] : memref<8xi32, #tpu.memory_space<smem>>
    %c0_i32_0 = arith.constant 0 : i32
    %c63_i32 = arith.constant 63 : i32
    %4 = arith.maxsi %c0_i32_0, %3 : i32
    %5 = arith.minsi %c63_i32, %4 : i32
    %6 = arith.index_cast %5 : i32 to index
    %c0 = arith.constant 0 : index
    %7 = vector.load %arg2[%6, %c0] : memref<64x128xf32, #tpu.memory_space<vmem>>, vector<1x128xf32>
    %8 = arith.index_cast %c0_i32 : i32 to index
    %c0_1 = arith.constant 0 : index
    %9 = vector.load %arg3[%8, %c0_1] : memref<8x128xf32, #tpu.memory_space<vmem>>, vector<1x128xf32>
    tpu.vector_store %arg3[%8, %c0_1], %7 {strides = array<i32>} : memref<8x128xf32, #tpu.memory_space<vmem>>, vector<1x128xf32>,
    %c1_i32 = arith.constant 1 : i32
    %10 = arith.addi %0, %c1_i32 : i32
    %11 = arith.index_cast %10 : i32 to index
    %12 = memref.load %arg1[%11] : memref<8xi32, #tpu.memory_space<smem>>
    %c0_i32_2 = arith.constant 0 : i32
    %c63_i32_3 = arith.constant 63 : i32
    %13 = arith.maxsi %c0_i32_2, %12 : i32
    %14 = arith.minsi %c63_i32_3, %13 : i32
    %15 = arith.index_cast %14 : i32 to index
    %c0_4 = arith.constant 0 : index
    %16 = vector.load %arg2[%15, %c0_4] : memref<64x128xf32, #tpu.memory_space<vmem>>, vector<1x128xf32>
    %17 = arith.index_cast %c1_i32 : i32 to index
    %c0_5 = arith.constant 0 : index
    %18 = vector.load %arg3[%17, %c0_5] : memref<8x128xf32, #tpu.memory_space<vmem>>, vector<1x128xf32>
    tpu.vector_store %arg3[%17, %c0_5], %16 {strides = array<i32>} : memref<8x128xf32, #tpu.memory_space<vmem>>, vector<1x128xf32>,
    %c2_i32 = arith.constant 2 : i32
    %19 = arith.addi %0, %c2_i32 : i32
    %20 = arith.index_cast %19 : i32 to index
    %21 = memref.load %arg1[%20] : memref<8xi32, #tpu.memory_space<smem>>
    %c0_i32_6 = arith.constant 0 : i32
    %c63_i32_7 = arith.constant 63 : i32
    %22 = arith.maxsi %c0_i32_6, %21 : i32
    %23 = arith.minsi %c63_i32_7, %22 : i32
    %24 = arith.index_cast %23 : i32 to index
    %c0_8 = arith.constant 0 : index
    %25 = vector.load %arg2[%24, %c0_8] : memref<64x128xf32, #tpu.memory_space<vmem>>, vector<1x128xf32>
    %26 = arith.index_cast %c2_i32 : i32 to index
    %c0_9 = arith.constant 0 : index
    %27 = vector.load %arg3[%26, %c0_9] : memref<8x128xf32, #tpu.memory_space<vmem>>, vector<1x128xf32>
    tpu.vector_store %arg3[%26, %c0_9], %25 {strides = array<i32>} : memref<8x128xf32, #tpu.memory_space<vmem>>, vector<1x128xf32>,
    %c3_i32 = arith.constant 3 : i32
    %28 = arith.addi %0, %c3_i32 : i32
    %29 = arith.index_cast %28 : i32 to index
    %30 = memref.load %arg1[%29] : memref<8xi32, #tpu.memory_space<smem>>
    %c0_i32_10 = arith.constant 0 : i32
    %c63_i32_11 = arith.constant 63 : i32
    %31 = arith.maxsi %c0_i32_10, %30 : i32
    %32 = arith.minsi %c63_i32_11, %31 : i32
    %33 = arith.index_cast %32 : i32 to index
    %c0_12 = arith.constant 0 : index
    %34 = vector.load %arg2[%33, %c0_12] : memref<64x128xf32, #tpu.memory_space<vmem>>, vector<1x128xf32>
    %35 = arith.index_cast %c3_i32 : i32 to index
    %c0_13 = arith.constant 0 : index
    %36 = vector.load %arg3[%35, %c0_13] : memref<8x128xf32, #tpu.memory_space<vmem>>, vector<1x128xf32>
    tpu.vector_store %arg3[%35, %c0_13], %34 {strides = array<i32>} : memref<8x128xf32, #tpu.memory_space<vmem>>, vector<1x128xf32>,
    %c4_i32 = arith.constant 4 : i32
    %37 = arith.addi %0, %c4_i32 : i32
    %38 = arith.index_cast %37 : i32 to index
    %39 = memref.load %arg1[%38] : memref<8xi32, #tpu.memory_space<smem>>
    %c0_i32_14 = arith.constant 0 : i32
    %c63_i32_15 = arith.constant 63 : i32
    %40 = arith.maxsi %c0_i32_14, %39 : i32
    %41 = arith.minsi %c63_i32_15, %40 : i32
    %42 = arith.index_cast %41 : i32 to index
    %c0_16 = arith.constant 0 : index
    %43 = vector.load %arg2[%42, %c0_16] : memref<64x128xf32, #tpu.memory_space<vmem>>, vector<1x128xf32>
    %44 = arith.index_cast %c4_i32 : i32 to index
    %c0_17 = arith.constant 0 : index
    %45 = vector.load %arg3[%44, %c0_17] : memref<8x128xf32, #tpu.memory_space<vmem>>, vector<1x128xf32>
    tpu.vector_store %arg3[%44, %c0_17], %43 {strides = array<i32>} : memref<8x128xf32, #tpu.memory_space<vmem>>, vector<1x128xf32>,
    %c5_i32 = arith.constant 5 : i32
    %46 = arith.addi %0, %c5_i32 : i32
    %47 = arith.index_cast %46 : i32 to index
    %48 = memref.load %arg1[%47] : memref<8xi32, #tpu.memory_space<smem>>
    %c0_i32_18 = arith.constant 0 : i32
    %c63_i32_19 = arith.constant 63 : i32
    %49 = arith.maxsi %c0_i32_18, %48 : i32
    %50 = arith.minsi %c63_i32_19, %49 : i32
    %51 = arith.index_cast %50 : i32 to index
    %c0_20 = arith.constant 0 : index
    %52 = vector.load %arg2[%51, %c0_20] : memref<64x128xf32, #tpu.memory_space<vmem>>, vector<1x128xf32>
    %53 = arith.index_cast %c5_i32 : i32 to index
    %c0_21 = arith.constant 0 : index
    %54 = vector.load %arg3[%53, %c0_21] : memref<8x128xf32, #tpu.memory_space<vmem>>, vector<1x128xf32>
    tpu.vector_store %arg3[%53, %c0_21], %52 {strides = array<i32>} : memref<8x128xf32, #tpu.memory_space<vmem>>, vector<1x128xf32>,
    %c6_i32 = arith.constant 6 : i32
    %55 = arith.addi %0, %c6_i32 : i32
    %56 = arith.index_cast %55 : i32 to index
    %57 = memref.load %arg1[%56] : memref<8xi32, #tpu.memory_space<smem>>
    %c0_i32_22 = arith.constant 0 : i32
    %c63_i32_23 = arith.constant 63 : i32
    %58 = arith.maxsi %c0_i32_22, %57 : i32
    %59 = arith.minsi %c63_i32_23, %58 : i32
    %60 = arith.index_cast %59 : i32 to index
    %c0_24 = arith.constant 0 : index
    %61 = vector.load %arg2[%60, %c0_24] : memref<64x128xf32, #tpu.memory_space<vmem>>, vector<1x128xf32>
    %62 = arith.index_cast %c6_i32 : i32 to index
    %c0_25 = arith.constant 0 : index
    %63 = vector.load %arg3[%62, %c0_25] : memref<8x128xf32, #tpu.memory_space<vmem>>, vector<1x128xf32>
    tpu.vector_store %arg3[%62, %c0_25], %61 {strides = array<i32>} : memref<8x128xf32, #tpu.memory_space<vmem>>, vector<1x128xf32>,
    %c7_i32 = arith.constant 7 : i32
    %64 = arith.addi %0, %c7_i32 : i32
    %65 = arith.index_cast %64 : i32 to index
    %66 = memref.load %arg1[%65] : memref<8xi32, #tpu.memory_space<smem>>
    %c0_i32_26 = arith.constant 0 : i32
    %c63_i32_27 = arith.constant 63 : i32
    %67 = arith.maxsi %c0_i32_26, %66 : i32
    %68 = arith.minsi %c63_i32_27, %67 : i32
    %69 = arith.index_cast %68 : i32 to index
    %c0_28 = arith.constant 0 : index
    %70 = vector.load %arg2[%69, %c0_28] : memref<64x128xf32, #tpu.memory_space<vmem>>, vector<1x128xf32>
    %71 = arith.index_cast %c7_i32 : i32 to index
    %c0_29 = arith.constant 0 : index
    %72 = vector.load %arg3[%71, %c0_29] : memref<8x128xf32, #tpu.memory_space<vmem>>, vector<1x128xf32>
    tpu.vector_store %arg3[%71, %c0_29], %70 {strides = array<i32>} : memref<8x128xf32, #tpu.memory_space<vmem>>, vector<1x128xf32>,
    %c8_i32_30 = arith.constant 8 : i32
    return
  }
  func.func @transform_0(%arg0: i32, %arg1: memref<8xi32, #tpu.memory_space<smem>>) -> (i32, i32) {
    %c0_i32 = arith.constant 0 : i32
    %c0_i32_0 = arith.constant 0 : i32
    %c0_i32_1 = arith.constant 0 : i32
    return %c0_i32, %c0_i32_0 : i32, i32
  }
  func.func @transform_1(%arg0: i32, %arg1: memref<8xi32, #tpu.memory_space<smem>>) -> (i32, i32) {
    %c0_i32 = arith.constant 0 : i32
    %c0_i32_0 = arith.constant 0 : i32
    return %arg0, %c0_i32 : i32, i32
  }
}

</mosaic_0001>

<bundles_post_ra>
// kernel: tpu_custom_call.1
= control target key start
LH: loop header
LB: loop body
LE: loop exit
PB: predicated region body
PF: predicated region fallthrough
CT: control target
= control target key end

     0   :  { %s265_s12 = smov [#allocation3]   ;;  %s304_s0 = inlined_call_operand.hbm [shape: s32[8], index: 0, kind: input, shape index: {}]   ;;  %s305_s1 = inlined_call_operand.hbm [shape: f32[64,128], index: 1, kind: input, shape index: {}]   ;;  %s306_s2 = inlined_call_operand.hbm [shape: f32[8,128], index: 2, kind: output, shape index: {}]  }
   0x1   :  { %s8_s11 = sshll.u32 %s304_s0, 4  ;;  %s9_s11 = int_to_ptr.hbm [resolvable:$true] %s8_s11 }
   0x2   :  { %11 = dma.hbm_to_smem %s9_s11, 16, %s265_s12, [#allocation2] }
   0x3   :  { %259 = dma.done.wait [#allocation2], 16 }
   0x4   :  { %260 = vsyncadd [#allocation2], 4294967280 }
   0x5   :  { %14 = sfence }
   0x6   :  { %15 = vsyncpa [#allocation5], 0 }
   0x7   :  { %16 = vsyncpa [#allocation6], 0  ;;  %s21_s15 = sshll.u32 %s305_s1, 4  ;;  %s266_s16 = smov [#allocation4]   ;;  %s22_s15 = int_to_ptr.hbm [resolvable:$true] %s21_s15 }
   0x8   :  { %s23_s17 = sshll.u32 %s266_s16, 4  ;;  %s267_s18 = smov 128   ;;  %s24_s17 = int_to_ptr.vmem [resolvable:$true] %s23_s17 }
   0x9   :  { %s268_s19 = smov 8  }
   0xa   :  { %29 = dma.hbm_to_vmem [thread:$0]  %s22_s15, 1024, %s24_s17, [#allocation5], %s267_s18, %s267_s18, %s268_s19  }
   0xb   :  { %261 = dma.done.wait [#allocation5], 1024  }
   0xc   :  { %262 = vsyncadd [#allocation5], 4294966272  ;;  %s35_s0 = sld [smem:[#allocation3]]  ;;  %s269_s5 = smov [#allocation7]  }
   0xd   :  { %s136_s20 = sld [smem:[#allocation3 + $0x1]]  ;;  %s111_s6 = sshll.u32 %s269_s5, 4  ;;  %s112_s6 = int_to_ptr.vmem [resolvable:$true] %s111_s6 }
   0xe   :  { %s142_s21 = sld [smem:[#allocation3 + $0x2]]  ;;  %s113_s9 = sshll.u32 %s306_s2, 4  ;;  %s114_s9 = int_to_ptr.hbm [resolvable:$true] %s113_s9 }
   0xf   :  { %s148_s22 = sld [smem:[#allocation3 + $0x3]] }
  0x10   :  { %s291_s23 = sld [smem:[#allocation3 + $0x4]] }
  0x11   :  { %s293_s24 = sld [smem:[#allocation3 + $0x5]] }
  0x12   :  { %p36_p0 = scmp.gt.s32.totalorder %s35_s0, 0  ;;  %p131_p1 = scmp.lt.s32.totalorder %s35_s0, 63 }
  0x13   :  { %p45_p2 = scmp.gt.s32.totalorder %s136_s20, 0  ;;  %p137_p3 = scmp.lt.s32.totalorder %s136_s20, 63 }
  0x14   :  { %s308_s0 = smov (!%p36_p0, %s35_s0), 0  ;;  %p54_p4 = scmp.gt.s32.totalorder %s142_s21, 0 }
  0x15   :  { %s310_s20 = smov (!%p45_p2, %s136_s20), 0  ;;  %s312_s0 = smov (!%p131_p1, %s308_s0), 63 }
  0x16   :  { %s314_s20 = smov (!%p137_p3, %s310_s20), 63  ;;  %s40_s1 = scalar_lea.vmem [#allocation4], %s312_s0 }
  0x17   :  { %v41_v0 = vld [vmem:[%s40_s1] sm:$0x1]  ;;  %p143_p5 = scmp.lt.s32.totalorder %s142_s21, 63  ;;  %s49_s25 = scalar_lea.vmem [#allocation4], %s314_s20 }
  0x18   :  { %42 = vst [vmem:[#allocation7] sm:$0x1] %v41_v0  ;;  %v50_v1 = vld [vmem:[%s49_s25] sm:$0x1]  ;;  %s316_s21 = smov (!%p54_p4, %s142_s21), 0  ;;  %p63_p6 = scmp.gt.s32.totalorder %s148_s22, 0 }
  0x19   :  { %51 = vst [vmem:[#allocation7 + $0x1] sm:$0x1] %v50_v1  ;;  %p149_p7 = scmp.lt.s32.totalorder %s148_s22, 63  ;;  %s318_s21 = smov (!%p143_p5, %s316_s21), 63 }
  0x1a   :  { %s320_s22 = smov (!%p63_p6, %s148_s22), 0  ;;  %p72_p8 = scmp.gt.s32.totalorder %s291_s23, 0 }
  0x1b   :  { %s58_s26 = scalar_lea.vmem [#allocation4], %s318_s21  ;;  %s322_s22 = smov (!%p149_p7, %s320_s22), 63 }
  0x1c   :  { %v59_v2 = vld [vmem:[%s58_s26] sm:$0x1]  ;;  %s73_s27 = scalar_select %p72_p8, %s291_s23, 0 }
  0x1d   :  { %60 = vst [vmem:[#allocation7 + $0x2] sm:$0x1] %v59_v2  ;;  %p155_p9 = scmp.lt.s32.totalorder %s291_s23, 63  ;;  %s67_s28 = scalar_lea.vmem [#allocation4], %s322_s22 }
  0x1e   :  { %v68_v3 = vld [vmem:[%s67_s28] sm:$0x1]  ;;  %p81_p10 = scmp.gt.s32.totalorder %s293_s24, 0  ;;  %p161_p11 = scmp.lt.s32.totalorder %s293_s24, 63 }
  0x1f   :  { %69 = vst [vmem:[#allocation7 + $0x3] sm:$0x1] %v68_v3  ;;  %s324_s27 = smov (!%p155_p9, %s73_s27), 63  ;;  %s166_s29 = sld [smem:[#allocation3 + $0x6]] }
  0x20   :  { %s326_s24 = smov (!%p81_p10, %s293_s24), 0  ;;  %s76_s30 = scalar_lea.vmem [#allocation4], %s324_s27 }
  0x21   :  { %v77_v4 = vld [vmem:[%s76_s30] sm:$0x1]  ;;  %s328_s24 = smov (!%p161_p11, %s326_s24), 63  ;;  %s172_s3 = sld [smem:[#allocation3 + $0x7]] }
  0x22   :  { %78 = vst [vmem:[#allocation7 + $0x4] sm:$0x1] %v77_v4  ;;  %s85_s4 = scalar_lea.vmem [#allocation4], %s328_s24 }
  0x23   :  { %v86_v5 = vld [vmem:[%s85_s4] sm:$0x1] }
  0x24   :  { %87 = vst [vmem:[#allocation7 + $0x5] sm:$0x1] %v86_v5 }
  0x25   :  { %p90_p12 = scmp.gt.s32.totalorder %s166_s29, 0  ;;  %p167_p13 = scmp.lt.s32.totalorder %s166_s29, 63 }
  0x27   :  { %s330_s29 = smov (!%p90_p12, %s166_s29), 0  ;;  %p99_p0 = scmp.gt.s32.totalorder %s172_s3, 0 }
  0x28   :  { %p173_p1 = scmp.lt.s32.totalorder %s172_s3, 63  ;;  %s332_s29 = smov (!%p167_p13, %s330_s29), 63 }
  0x29   :  { %s334_s3 = smov (!%p99_p0, %s172_s3), 0  ;;  %s94_s10 = scalar_lea.vmem [#allocation4], %s332_s29 }
  0x2a   :  { %v95_v6 = vld [vmem:[%s94_s10] sm:$0x1]  ;;  %s336_s3 = smov (!%p173_p1, %s334_s3), 63 }
  0x2b   :  { %96 = vst [vmem:[#allocation7 + $0x6] sm:$0x1] %v95_v6  ;;  %s103_s11 = scalar_lea.vmem [#allocation4], %s336_s3 }
  0x2c   :  { %v104_v7 = vld [vmem:[%s103_s11] sm:$0x1] }
  0x2d   :  { %105 = vst [vmem:[#allocation7 + $0x7] sm:$0x1] %v104_v7 }
  0x2e   :  { %116 = dma.vmem_to_hbm [thread:$0]  %s112_s6, 128, %s114_s9, [#allocation6]  }
  0x2f   :  { %263 = dma.done.wait [#allocation6], 128  }
  0x30   :  { %264 = vsyncadd [#allocation6], 4294967168 }
  0x31   :  { %121 = vsyncpa [#allocation5], 1 }
  0x32   :  { %122 = vsyncpa [#allocation6], 1 }

</bundles_post_ra>
